<compile_context>
chip_gen: v7x
topology: tpu7x:2x2x1
jax: 0.10.0
libtpu: 0.0.40
codegen_flags: <defaults>
</compile_context>

<pallas_src>
import jax
import jax.numpy as jnp
from jax.experimental import pallas as pl
from jax.experimental.pallas import tpu as pltpu


def _mean_std_kernel(x_ref, mean_ref, std_ref, o_ref):
    # x_ref: (TB, TF); mean_ref/std_ref: (1, TF); o_ref: (TB, TF)
    x = x_ref[...].astype(jnp.float32)
    m = mean_ref[...].astype(jnp.float32)
    # Exact reciprocal on a single (1, TF) row (TF divides, not TB*TF divides),
    # then a broadcast multiply on the VPU.
    inv_s = 1.0 / std_ref[...].astype(jnp.float32)
    o_ref[...] = ((x - m) * inv_s).astype(o_ref.dtype)


def _mean_std_tiled(x, mean, std, tile_b, tile_f, vmem_limit_bytes):
    B, F = x.shape
    grid = (pl.cdiv(B, tile_b), pl.cdiv(F, tile_f))
    return pl.pallas_call(
        _mean_std_kernel,
        out_shape=jax.ShapeDtypeStruct((B, F), x.dtype),
        grid_spec=pltpu.PrefetchScalarGridSpec(
            num_scalar_prefetch=0,
            grid=grid,
            in_specs=[
                pl.BlockSpec((tile_b, tile_f), lambda i, j: (i, j)),
                pl.BlockSpec((1, tile_f), lambda i, j: (0, j)),  # mean (bcast rows)
                pl.BlockSpec((1, tile_f), lambda i, j: (0, j)),  # std  (bcast rows)
            ],
            out_specs=pl.BlockSpec((tile_b, tile_f), lambda i, j: (i, j)),
        ),
        compiler_params=pltpu.CompilerParams(
            dimension_semantics=("parallel", "parallel"),
            vmem_limit_bytes=vmem_limit_bytes,
        ),
    )(x, mean, std)


def mean_std_layer(x, mean, std, *, tile_b=None, tile_f=None,
                   vmem_limit_bytes=None):
    """y = (x - mean) / std with mean/std of shape (1, size_in)."""
    B, F = x.shape
    assert mean.shape == (1, F) and std.shape == (1, F)

    itemsize = jnp.dtype(x.dtype).itemsize
    sub = max(8, 32 // itemsize)          # sublane granule: 8 f32, 16 bf16

    # --- Lane densification for narrow features (F < 128) -------------------
    # View (B, F) as (B/fold, F*fold) so the last dim fills all 128 lanes and
    # stores are unmasked; mean/std are simply tiled `fold` times.
    if tile_f is None and F < 128 and 128 % F == 0 and B % (128 // F) == 0:
        fold = 128 // F
        y = mean_std_layer(
            x.reshape(B // fold, F * fold),
            jnp.tile(mean, (1, fold)),
            jnp.tile(std, (1, fold)),
            tile_b=tile_b,
            vmem_limit_bytes=vmem_limit_bytes,
        )
        return y.reshape(B, F)

    # --- Feature (lane) tiling: multiples of 128 when possible --------------
    if tile_f is None:
        tile_f = min(F, 2048) if F % 128 == 0 else F

    # --- Batch (sublane) tiling: ~512 rows, capped at ~4 MiB per block ------
    if tile_b is None:
        target_block_bytes = 4 * 1024 * 1024
        rows_for_target = max(target_block_bytes // max(tile_f * itemsize, 1), 1)
        tile_b = min(B, 512, rows_for_target)
        if tile_b >= sub:
            tile_b = (tile_b // sub) * sub       # sublane aligned
        else:
            tile_b = B                           # tiny batch: full extent is legal
        # Ensure at least 2 batch programs when possible (v7x has 2 TCs).
        if pl.cdiv(B, tile_b) < 2 and B >= 2 * sub:
            tile_b = max(sub, (((B + 1) // 2) // sub) * sub)

    return _mean_std_tiled(x, mean, std, tile_b, tile_f, vmem_limit_bytes)


if __name__ == "__main__":
    key = jax.random.PRNGKey(0)

    def check(batch, size_in):
        kx, km, ks = jax.random.split(jax.random.fold_in(key, batch * 1000 + size_in), 3)
        x = jax.random.normal(kx, (batch, size_in), dtype=jnp.float32)
        mean = jax.random.normal(km, (1, size_in), dtype=jnp.float32)
        std = jax.random.uniform(ks, (1, size_in), dtype=jnp.float32,
                                 minval=0.5, maxval=2.0)
        y = jax.block_until_ready(mean_std_layer(x, mean, std))
        y_ref = (x - mean) / std
        assert jnp.allclose(y, y_ref, atol=1e-5, rtol=1e-5), \
            f"mismatch vs reference at shape ({batch}, {size_in})"

    check(8, 32)       # small case matching module defaults (lane-densified path)
    check(20, 384)     # ragged batch tail + lane-aligned feature dim
    check(1024, 256)   # multi-block batch tiling (grid >= 2 on the batch axis)

    print("KERNEL_OK")
</pallas_src>

<mosaic_0001>
module attributes {stable_mosaic.version = 11 : i64} {
  func.func @_mean_std_kernel(%arg0: i32, %arg1: i32, %arg2: memref<2x128xf32, #tpu.memory_space<vmem>>, %arg3: memref<1x128xf32, #tpu.memory_space<vmem>>, %arg4: memref<1x128xf32, #tpu.memory_space<vmem>>, %arg5: memref<2x128xf32, #tpu.memory_space<vmem>>) attributes {dimension_semantics = [#tpu.dimension_semantics<parallel>, #tpu.dimension_semantics<parallel>], iteration_bounds = array<i64: 1, 1>, scalar_prefetch = 0 : i64, scratch_operands = 0 : i64, tpu.core_type = #tpu.core_type<tc>, window_params = [{transform_indices = @transform_0, window_bounds = array<i64: 2, 128>}, {transform_indices = @transform_1, window_bounds = array<i64: 1, 128>}, {transform_indices = @transform_2, window_bounds = array<i64: 1, 128>}, {transform_indices = @transform_3, window_bounds = array<i64: 2, 128>}]} {
    %c0 = arith.constant 0 : index
    %c0_0 = arith.constant 0 : index
    %0 = vector.load %arg2[%c0, %c0_0] : memref<2x128xf32, #tpu.memory_space<vmem>>, vector<2x128xf32>
    %c0_1 = arith.constant 0 : index
    %c0_2 = arith.constant 0 : index
    %1 = vector.load %arg3[%c0_1, %c0_2] : memref<1x128xf32, #tpu.memory_space<vmem>>, vector<1x128xf32>
    %c0_3 = arith.constant 0 : index
    %c0_4 = arith.constant 0 : index
    %2 = vector.load %arg4[%c0_3, %c0_4] : memref<1x128xf32, #tpu.memory_space<vmem>>, vector<1x128xf32>
    %cst = arith.constant 1.000000e+00 : f32
    %3 = vector.broadcast %cst : f32 to vector<1x128xf32>
    %4 = arith.divf %3, %2 : vector<1x128xf32>
    %5 = vector.broadcast %1 : vector<1x128xf32> to vector<2x128xf32>
    %6 = arith.subf %0, %5 : vector<2x128xf32>
    %7 = vector.broadcast %4 : vector<1x128xf32> to vector<2x128xf32>
    %8 = arith.mulf %6, %7 : vector<2x128xf32>
    %c0_5 = arith.constant 0 : index
    %c0_6 = arith.constant 0 : index
    %9 = vector.load %arg5[%c0_5, %c0_6] : memref<2x128xf32, #tpu.memory_space<vmem>>, vector<2x128xf32>
    tpu.vector_store %arg5[%c0_5, %c0_6], %8 {strides = array<i32>} : memref<2x128xf32, #tpu.memory_space<vmem>>, vector<2x128xf32>,
    return
  }
  func.func @transform_0(%arg0: i32, %arg1: i32) -> (i32, i32) {
    %c0_i32 = arith.constant 0 : i32
    return %arg0, %arg1 : i32, i32
  }
  func.func @transform_1(%arg0: i32, %arg1: i32) -> (i32, i32) {
    %c0_i32 = arith.constant 0 : i32
    %c0_i32_0 = arith.constant 0 : i32
    return %c0_i32, %arg1 : i32, i32
  }
  func.func @transform_2(%arg0: i32, %arg1: i32) -> (i32, i32) {
    %c0_i32 = arith.constant 0 : i32
    %c0_i32_0 = arith.constant 0 : i32
    return %c0_i32, %arg1 : i32, i32
  }
  func.func @transform_3(%arg0: i32, %arg1: i32) -> (i32, i32) {
    %c0_i32 = arith.constant 0 : i32
    return %arg0, %arg1 : i32, i32
  }
}

</mosaic_0001>

<bundles_post_ra>
// kernel: tpu_custom_call.1
= control target key start
LH: loop header
LB: loop body
LE: loop exit
PB: predicated region body
PF: predicated region fallthrough
CT: control target
= control target key end

     0   :  { %8 = vsyncpa [#allocation3], 0  ;;  %s167_s0 = inlined_call_operand.hbm [shape: f32[2,128], index: 0, kind: input, shape index: {}]   ;;  %s168_s1 = inlined_call_operand.vmem [shape: f32[1,128], index: 1, kind: input, shape index: {}]   ;;  %s169_s2 = inlined_call_operand.vmem [shape: f32[1,128], index: 2, kind: input, shape index: {}]   ;;  %s170_s3 = inlined_call_operand.hbm [shape: f32[2,128], index: 3, kind: output, shape index: {}]  }
   0x1   :  { %9 = vsyncpa [#allocation4], 0  ;;  %s115_s12 = smov [#allocation2]   ;;  %s67_s16 = scalar_lea.hbm %s167_s0, 32 }
   0x2   :  { %s16_s13 = sshll.u32 %s115_s12, 4  ;;  %p68_p0 = scmp.ne.s32.totalorder %s167_s0, %s67_s16  ;;  %s17_s13 = int_to_ptr.vmem [resolvable:$true] %s16_s13 }
   0x3   :  { %p71_p1 = scmp.lt.u32.totalorder %s67_s16, %s167_s0 }
   0x5   :  { %p73_p2 = pnand %p71_p1, %p68_p0 }
   0x7   :  { %76 = shalt.err (!%p73_p2)
}
   0x8   :  { %s77_s21 = scalar_lea.vmem %s17_s13, 32  ;;  %p82_p4 = scmp.lt.s32.totalorder %s17_s13, %s17_s13 }
   0x9   :  { %p78_p3 = scmp.ne.s32.totalorder %s17_s13, %s77_s21  ;;  %p83_p5 = scmp.lt.s32.totalorder %s77_s21, %s77_s21 }
   0xb   :  { %p84_p6 = por %p83_p5, %p82_p4 }
   0xd   :  { %p85_p7 = pnand %p84_p6, %p78_p3 }
   0xf   :  { %88 = shalt.err (!%p85_p7)
}
  0x10   :  { %19 = dma.hbm_to_vmem [thread:$0]  %s167_s0, 32, %s17_s13, [#allocation3]  }
  0x11   :  { %111 = dma.done.wait [#allocation3], 32  }
  0x12   :  { %112 = vsyncadd [#allocation3], 4294967264  ;;  %v29_v0 = vld [vmem:[%s169_s2] sm:$0x1]  ;;  %v40_v1 = vlaneseq  ;;  %s116_s28 = smov [#allocation5]  }
  0x13   :  { %65 = vrcp.f32 %v29_v0  ;;  %v27_v3 = vld [vmem:[#allocation2] sm:$0x3]  ;;  %s53_s29 = sshll.u32 %s116_s28, 4  ;;  %s54_s29 = int_to_ptr.vmem [resolvable:$true] %s53_s29 }
  0x14   :  { %v41_v2 = vshrl.u32 %v40_v1, 7  ;;  %v62_v4 = vld [vmem:[%s168_s1] ss:$0 sm:$0xff]  ;;  %s89_s0 = scalar_lea.vmem %s54_s29, 32  ;;  %p94_p9 = scmp.lt.s32.totalorder %s54_s29, %s54_s29 }
  0x15   :  { %v38_v6 = vsub.f32 %v27_v3, %v62_v4  ;;  %p90_p8 = scmp.ne.s32.totalorder %s54_s29, %s89_s0  ;;  %p95_p10 = scmp.lt.s32.totalorder %s89_s0, %s89_s0 }
  0x16   :  { %v42_v5 = vsub.s32 0, %v41_v2 }
  0x17   :  { %p96_p11 = por %p95_p10, %p94_p9 }
  0x19   :  { %p97_p12 = pnand %p96_p11, %p90_p8 }
  0x1d   :  { %v66_v7 = vpop.eup %65 }
  0x1e   :  { %v43_v8 = vrot.slane %v66_v7, %v42_v5 }
  0x20   :  { %v45_v9 = vmul.f32 %v43_v8, %v38_v6 }
  0x22   :  { %46 = vst [vmem:[#allocation5] sm:$0x3] %v45_v9 }
  0x23   :  { %100 = shalt.err (!%p97_p12)
}
  0x24   :  { %s101_s1 = scalar_lea.hbm %s170_s3, 32 }
  0x25   :  { %p102_p13 = scmp.ne.s32.totalorder %s170_s3, %s101_s1  ;;  %p105_p0 = scmp.lt.u32.totalorder %s101_s1, %s170_s3 }
  0x27   :  { %p107_p1 = pnand %p105_p0, %p102_p13 }
  0x29   :  { %110 = shalt.err (!%p107_p1)
}
  0x2a   :  { %56 = dma.vmem_to_hbm [thread:$0]  %s54_s29, 32, %s170_s3, [#allocation4]  }
  0x2b   :  { %113 = dma.done.wait [#allocation4], 32  }
  0x2c   :  { %114 = vsyncadd [#allocation4], 4294967264 }
  0x2d   :  { %60 = vsyncpa [#allocation3], 1 }
  0x2e   :  { %61 = vsyncpa [#allocation4], 1 }

</bundles_post_ra>
